<compile_context>
chip_gen: v7x
topology: tpu7x:2x2x1
jax: 0.10.0
libtpu: 0.0.40
codegen_flags: <defaults>
</compile_context>

<pallas_src>
import functools

import jax
import jax.numpy as jnp
from jax.experimental import pallas as pl
from jax.experimental.pallas import tpu as pltpu

EPS = 1e-5


# --------------------------------------------------------------------------- #
# Generation-aware tuning
# --------------------------------------------------------------------------- #
def _tpu_tuning():
    """Per-generation (block_budget, vmem_limit, min_grid, bf16_fma) heuristics.

    block_budget counts in-block + out-block + one f32 working copy per grid
    step (double-buffering of in/out brings total VMEM to ~1.7x the budget).
    """
    kind = ""
    try:
        kind = jax.devices()[0].device_kind.lower()
    except Exception:  # pragma: no cover - defensive
        pass
    vmem_cap = None
    try:
        vmem_cap = getattr(pltpu.get_tpu_info(), "vmem_capacity_bytes", None)
    except Exception:  # pragma: no cover - defensive
        pass

    is_v7 = ("v7" in kind) or (vmem_cap is not None and vmem_cap <= (64 << 20))
    if is_v7:
        # 64 MiB physical VMEM, 2 TensorCores: small blocks, >= 4 grid steps.
        return dict(block_budget=18 << 20, vmem_limit=44 << 20, min_grid=4,
                    bf16_fma=True)
    if "v6" in kind:
        return dict(block_budget=30 << 20, vmem_limit=80 << 20, min_grid=2,
                    bf16_fma=True)
    if "v5" in kind:
        # v5e VPU has no bf16 path -> keep f32 output FMA.
        return dict(block_budget=30 << 20, vmem_limit=80 << 20, min_grid=2,
                    bf16_fma=False)
    # Unknown chip: be v7x-safe.
    return dict(block_budget=18 << 20, vmem_limit=44 << 20, min_grid=2,
                bf16_fma=False)


def _pick_channel_tile(C, per_channel_block_bytes, block_budget, min_grid):
    """Largest multiple-of-8 channel tile that fits the VMEM budget and gives
    >= min_grid grid steps. Returns None if even an 8-channel slab is too big
    (caller falls back to the two-phase spatially-tiled path)."""
    min_tc = C if C < 8 else 8
    if per_channel_block_bytes * min_tc > block_budget:
        return None
    cap_budget = max(min_tc, block_budget // max(1, per_channel_block_bytes))
    # Ensure >= min_grid steps whenever C can actually be split into >=8 tiles.
    cap_grid = max(8, C // max(1, min_grid)) if C >= 16 else C
    cap = min(C, cap_budget, cap_grid)
    if cap >= C:
        return C
    tc = min(C, max(8, (cap // 8) * 8))
    # Prefer a nearby tile that divides C (avoids padded boundary channels).
    for cand in range(tc, max(7, tc - 40), -8):
        if cand >= 8 and C % cand == 0:
            return cand
    return tc


# --------------------------------------------------------------------------- #
# One-pass kernel (stats + normalize fused, whole H*W per block)
# --------------------------------------------------------------------------- #
def _bn2d_onepass_kernel(x_ref, gamma_ref, beta_ref, o_ref, *, tc, inv_m,
                         bf16_fma):
    # x_ref / o_ref: (N, TC, HWp); gamma_ref / beta_ref: (C_pad, 1) untiled.
    x = x_ref[...]
    xf = x.astype(jnp.float32)

    # Fused single-pass statistics: sum and sum-of-squares together.
    s1 = jnp.sum(xf, axis=(0, 2), keepdims=True)            # (1, TC, 1)
    s2 = jnp.sum(xf * xf, axis=(0, 2), keepdims=True)
    mean = s1 * inv_m
    var = jnp.maximum(s2 * inv_m - mean * mean, 0.0)         # guard cancellation
    inv_std = jax.lax.rsqrt(var + EPS)                        # EUP slot

    # Slice this tile's affine params out of the single resident VMEM block.
    start = pl.program_id(0) * tc
    if tc % 8 == 0:
        start = pl.multiple_of(start, 8)
    gamma = gamma_ref[pl.ds(start, tc), :].reshape(1, tc, 1)
    beta = beta_ref[pl.ds(start, tc), :].reshape(1, tc, 1)

    # Fold normalization + affine into a per-channel FMA.
    scale = gamma * inv_std
    shift = beta - mean * scale
    if bf16_fma:
        y = x * scale.astype(x.dtype) + shift.astype(x.dtype)
    else:
        y = xf * scale + shift
    o_ref[...] = y.astype(o_ref.dtype)


# --------------------------------------------------------------------------- #
# Two-phase fallback for oversize per-channel slabs (spatially tiled)
# --------------------------------------------------------------------------- #
def _bn2d_stats_kernel(x_ref, sum_ref, sumsq_ref, *, ts, hw):
    s = pl.program_id(1)

    @pl.when(s == 0)
    def _():
        sum_ref[...] = jnp.zeros_like(sum_ref)
        sumsq_ref[...] = jnp.zeros_like(sumsq_ref)

    x = x_ref[...].astype(jnp.float32)                       # (N, TC, TS)
    if hw % ts != 0:
        # Mask the spatial padding of the boundary tile out of the sums.
        col = jax.lax.broadcasted_iota(jnp.int32, x.shape, 2) + s * ts
        x = jnp.where(col < hw, x, 0.0)
    sum_ref[...] += jnp.sum(x, axis=(0, 2)).reshape(sum_ref.shape)
    sumsq_ref[...] += jnp.sum(x * x, axis=(0, 2)).reshape(sumsq_ref.shape)


def _bn2d_normalize_kernel(x_ref, scale_ref, shift_ref, o_ref, *, bf16_fma):
    tc = scale_ref.shape[0]
    scale = scale_ref[...].reshape(1, tc, 1)                  # f32
    shift = shift_ref[...].reshape(1, tc, 1)
    x = x_ref[...]
    if bf16_fma:
        y = x * scale.astype(x.dtype) + shift.astype(x.dtype)
    else:
        y = x.astype(jnp.float32) * scale + shift
    o_ref[...] = y.astype(o_ref.dtype)


def _bn2d_two_phase(x3d, gamma, beta, N, C, HW, tune, bf16_fma):
    """Stats pass (grid over channels x spatial) + normalize pass.

    2 HBM reads + 1 write per element; stays near roofline for activations too
    large for a single per-channel VMEM slab.
    """
    itemsize = x3d.dtype.itemsize
    TC = C if C < 8 else 8
    c_tiles = pl.cdiv(C, TC)
    C_pad = c_tiles * TC

    eff = 2 * itemsize + 4                                    # in + out + f32 temp
    ts_cap = tune["block_budget"] // max(1, N * TC * eff)
    if ts_cap >= HW or HW <= 128:
        TS = HW
    else:
        TS = max(128, (ts_cap // 128) * 128)
    s_tiles = pl.cdiv(HW, TS)
    # TODO(synk): for pathological N where even (N, 8, 128) exceeds the budget,
    # an N-tiled variant would be needed; not hit by realistic BN shapes.

    compiler_params = pltpu.CompilerParams(
        dimension_semantics=("parallel", "arbitrary"),
        vmem_limit_bytes=tune["vmem_limit"],
    )

    sums, sumsqs = pl.pallas_call(
        functools.partial(_bn2d_stats_kernel, ts=TS, hw=HW),
        out_shape=(jax.ShapeDtypeStruct((C_pad, 1), jnp.float32),
                   jax.ShapeDtypeStruct((C_pad, 1), jnp.float32)),
        grid=(c_tiles, s_tiles),
        in_specs=[pl.BlockSpec((N, TC, TS), lambda c, s: (0, c, s))],
        out_specs=(pl.BlockSpec((TC, 1), lambda c, s: (c, 0)),
                   pl.BlockSpec((TC, 1), lambda c, s: (c, 0))),
        compiler_params=compiler_params,
        cost_estimate=pl.CostEstimate(flops=int(3 * N * C * HW),
                                      transcendentals=0,
                                      bytes_accessed=int(N * C * HW * itemsize)),
    )(x3d)

    # Tiny per-channel math in plain JAX (C elements).
    inv_m = 1.0 / float(N * HW)
    mean = sums * inv_m
    var = jnp.maximum(sumsqs * inv_m - mean * mean, 0.0)
    inv_std = jax.lax.rsqrt(var + EPS)
    g = jnp.pad(gamma.astype(jnp.float32).reshape(C, 1),
                ((0, C_pad - C), (0, 0)), constant_values=1.0)
    b = jnp.pad(beta.astype(jnp.float32).reshape(C, 1), ((0, C_pad - C), (0, 0)))
    scale = g * inv_std
    shift = b - mean * scale

    out3d = pl.pallas_call(
        functools.partial(_bn2d_normalize_kernel, bf16_fma=bf16_fma),
        out_shape=jax.ShapeDtypeStruct((N, C, HW), x3d.dtype),
        grid=(c_tiles, s_tiles),
        in_specs=[pl.BlockSpec((N, TC, TS), lambda c, s: (0, c, s)),
                  pl.BlockSpec((TC, 1), lambda c, s: (c, 0)),
                  pl.BlockSpec((TC, 1), lambda c, s: (c, 0))],
        out_specs=pl.BlockSpec((N, TC, TS), lambda c, s: (0, c, s)),
        compiler_params=pltpu.CompilerParams(
            dimension_semantics=("parallel", "parallel"),
            vmem_limit_bytes=tune["vmem_limit"]),
        cost_estimate=pl.CostEstimate(flops=int(2 * N * C * HW),
                                      transcendentals=0,
                                      bytes_accessed=int(2 * N * C * HW * itemsize)),
    )(x3d, scale, shift)
    return out3d


# --------------------------------------------------------------------------- #
# Public wrapper
# --------------------------------------------------------------------------- #
def bn2d_forward(x, gamma, beta):
    """BatchNorm2d forward (training-mode statistics).

    x: (N, C, H, W); gamma/beta: (C,). Returns (N, C, H, W) in x.dtype.
    """
    N, C, H, W = x.shape
    HW = H * W
    itemsize = x.dtype.itemsize
    tune = _tpu_tuning()
    bf16_fma = bool(x.dtype == jnp.bfloat16 and tune["bf16_fma"])

    # Free reshape only — no transpose / extra HBM passes.
    x3d = x.reshape(N, C, HW)

    # Lane-density padding: pad H*W to a multiple of 128 when overhead <= 50%
    # (ResNet-style 196/784/3136), so output stores are unmasked full vregs.
    HWp = HW
    if HW % 128 != 0:
        cand = ((HW + 127) // 128) * 128
        if cand * 2 <= 3 * HW:
            HWp = cand

    per_channel_bytes = N * HWp * (2 * itemsize + 4)          # in + out + f32 temp
    TC = _pick_channel_tile(C, per_channel_bytes, tune["block_budget"],
                            tune["min_grid"])

    if TC is None:
        # Per-channel slab does not fit VMEM: two-phase spatially tiled path.
        out3d = _bn2d_two_phase(x3d, gamma, beta, N, C, HW, tune, bf16_fma)
        return out3d.reshape(N, C, H, W)

    if HWp != HW:
        x3d = jnp.pad(x3d, ((0, 0), (0, 0), (0, HWp - HW)))   # zeros: stats-safe

    c_tiles = pl.cdiv(C, TC)
    C_pad = c_tiles * TC
    g2d = jnp.pad(gamma.astype(jnp.float32).reshape(C, 1),
                  ((0, C_pad - C), (0, 0)), constant_values=1.0)
    b2d = jnp.pad(beta.astype(jnp.float32).reshape(C, 1), ((0, C_pad - C), (0, 0)))
    inv_m = 1.0 / float(N * HW)                               # real count, not padded

    kernel = functools.partial(_bn2d_onepass_kernel, tc=TC, inv_m=inv_m,
                               bf16_fma=bf16_fma)
    cost = pl.CostEstimate(
        flops=int(6 * N * C * HW),
        transcendentals=int(C),
        bytes_accessed=int(2 * N * C * HW * itemsize + 2 * C * 4),
    )

    out3d = pl.pallas_call(
        kernel,
        out_shape=jax.ShapeDtypeStruct((N, C, HWp), x.dtype),
        grid=(c_tiles,),
        in_specs=[
            pl.BlockSpec((N, TC, HWp), lambda c: (0, c, 0)),
            pl.BlockSpec((C_pad, 1), lambda c: (0, 0)),       # fetched once
            pl.BlockSpec((C_pad, 1), lambda c: (0, 0)),
        ],
        out_specs=pl.BlockSpec((N, TC, HWp), lambda c: (0, c, 0)),
        compiler_params=pltpu.CompilerParams(
            dimension_semantics=("parallel",),                # channel tiles independent
            vmem_limit_bytes=tune["vmem_limit"],
        ),
        cost_estimate=cost,
    )(x3d, g2d, b2d)

    if HWp != HW:
        out3d = out3d[:, :, :HW]
    return out3d.reshape(N, C, H, W)


def reference_bn2d(x, gamma, beta):
    mean = jnp.mean(x, axis=(0, 2, 3), keepdims=True)
    var = jnp.mean((x - mean) ** 2, axis=(0, 2, 3), keepdims=True)
    xhat = (x - mean) * jax.lax.rsqrt(var + EPS)
    return xhat * gamma.reshape(1, -1, 1, 1) + beta.reshape(1, -1, 1, 1)


if __name__ == "__main__":
    key = jax.random.PRNGKey(0)
    kx, kg, kb, kx2 = jax.random.split(key, 4)

    # Small shape consistent with BN2d(planes=4).
    N, C, H, W = 2, 4, 16, 16
    x = jax.random.normal(kx, (N, C, H, W), dtype=jnp.float32) * 2.0 + 0.5

    # Module init (weights_init_kaiming): gamma = 1, beta = 0.
    gamma_init = jnp.ones((C,), dtype=jnp.float32)
    beta_init = jnp.zeros((C,), dtype=jnp.float32)

    out = jax.block_until_ready(bn2d_forward(x, gamma_init, beta_init))
    ref = reference_bn2d(x, gamma_init, beta_init)
    assert out.shape == (N, C, H, W)
    assert jnp.max(jnp.abs(out - ref)) < 2e-4, "mismatch vs reference (init params)"

    # Non-trivial affine params exercise the folded FMA.
    gamma2 = 1.0 + 0.1 * jax.random.normal(kg, (C,), dtype=jnp.float32)
    beta2 = 0.1 * jax.random.normal(kb, (C,), dtype=jnp.float32)
    out2 = jax.block_until_ready(bn2d_forward(x, gamma2, beta2))
    ref2 = reference_bn2d(x, gamma2, beta2)
    assert jnp.max(jnp.abs(out2 - ref2)) < 2e-4, "mismatch vs reference (affine)"

    # Shape with C=32 exercises a multi-step channel grid (pipelined / megacore).
    N2, C2, H2, W2 = 2, 32, 8, 8
    x2 = jax.random.normal(kx2, (N2, C2, H2, W2), dtype=jnp.float32)
    g2 = 1.0 + 0.05 * jax.random.normal(kg, (C2,), dtype=jnp.float32)
    b2 = 0.05 * jax.random.normal(kb, (C2,), dtype=jnp.float32)
    out3 = jax.block_until_ready(bn2d_forward(x2, g2, b2))
    ref3 = reference_bn2d(x2, g2, b2)
    assert jnp.max(jnp.abs(out3 - ref3)) < 2e-4, "mismatch vs reference (tiled C)"

    # Exercise the two-phase (oversize-slab) fallback path directly.
    out4 = jax.block_until_ready(
        _bn2d_two_phase(x2.reshape(N2, C2, H2 * W2), g2, b2,
                        N2, C2, H2 * W2, _tpu_tuning(), bf16_fma=False))
    assert jnp.max(jnp.abs(out4.reshape(N2, C2, H2, W2) - ref3)) < 2e-4, \
        "mismatch vs reference (two-phase path)"

    print("KERNEL_OK")
</pallas_src>

<mosaic_0001>
module attributes {stable_mosaic.version = 11 : i64} {
  func.func @_bn2d_onepass_kernel(%arg0: i32, %arg1: memref<2x4x256xf32, #tpu.memory_space<vmem>>, %arg2: memref<4x1xf32, #tpu.memory_space<vmem>>, %arg3: memref<4x1xf32, #tpu.memory_space<vmem>>, %arg4: memref<2x4x256xf32, #tpu.memory_space<vmem>>) attributes {dimension_semantics = [#tpu.dimension_semantics<parallel>], iteration_bounds = array<i64: 1>, scalar_prefetch = 0 : i64, scratch_operands = 0 : i64, tpu.core_type = #tpu.core_type<tc>, window_params = [{transform_indices = @transform_0, window_bounds = array<i64: 2, 4, 256>}, {pipeline_mode = #tpu.pipeline_mode<synchronous>, transform_indices = @transform_1, window_bounds = array<i64: 4, 1>}, {pipeline_mode = #tpu.pipeline_mode<synchronous>, transform_indices = @transform_2, window_bounds = array<i64: 4, 1>}, {transform_indices = @transform_3, window_bounds = array<i64: 2, 4, 256>}]} {
    %c0 = arith.constant 0 : index
    %c0_0 = arith.constant 0 : index
    %c0_1 = arith.constant 0 : index
    %0 = vector.load %arg1[%c0, %c0_0, %c0_1] : memref<2x4x256xf32, #tpu.memory_space<vmem>>, vector<2x4x256xf32>
    %cst = arith.constant dense<0.000000e+00> : vector<4xf32>
    %1 = vector.multi_reduction <add>, %0, %cst [0, 2] : vector<2x4x256xf32> to vector<4xf32>
    %2 = vector.shape_cast %1 : vector<4xf32> to vector<1x4x1xf32>
    %3 = arith.mulf %0, %0 : vector<2x4x256xf32>
    %cst_2 = arith.constant dense<0.000000e+00> : vector<4xf32>
    %4 = vector.multi_reduction <add>, %3, %cst_2 [0, 2] : vector<2x4x256xf32> to vector<4xf32>
    %5 = vector.shape_cast %4 : vector<4xf32> to vector<1x4x1xf32>
    %cst_3 = arith.constant 0.001953125 : f32
    %6 = vector.broadcast %cst_3 : f32 to vector<1x4x1xf32>
    %7 = arith.mulf %2, %6 : vector<1x4x1xf32>
    %cst_4 = arith.constant 0.001953125 : f32
    %8 = vector.broadcast %cst_4 : f32 to vector<1x4x1xf32>
    %9 = arith.mulf %5, %8 : vector<1x4x1xf32>
    %10 = arith.mulf %7, %7 : vector<1x4x1xf32>
    %11 = arith.subf %9, %10 : vector<1x4x1xf32>
    %cst_5 = arith.constant 0.000000e+00 : f32
    %12 = vector.broadcast %cst_5 : f32 to vector<1x4x1xf32>
    %13 = arith.maximumf %11, %12 : vector<1x4x1xf32>
    %cst_6 = arith.constant 9.99999974E-6 : f32
    %14 = vector.broadcast %cst_6 : f32 to vector<1x4x1xf32>
    %15 = arith.addf %13, %14 : vector<1x4x1xf32>
    %16 = math.rsqrt %15 : vector<1x4x1xf32>
    %c4_i32 = arith.constant 4 : i32
    %17 = arith.muli %arg0, %c4_i32 : i32
    %18 = arith.index_cast %17 : i32 to index
    %c0_7 = arith.constant 0 : index
    %19 = vector.load %arg2[%18, %c0_7] : memref<4x1xf32, #tpu.memory_space<vmem>>, vector<4x1xf32>
    %20 = vector.shape_cast %19 : vector<4x1xf32> to vector<1x4x1xf32>
    %21 = arith.index_cast %17 : i32 to index
    %c0_8 = arith.constant 0 : index
    %22 = vector.load %arg3[%21, %c0_8] : memref<4x1xf32, #tpu.memory_space<vmem>>, vector<4x1xf32>
    %23 = vector.shape_cast %22 : vector<4x1xf32> to vector<1x4x1xf32>
    %24 = arith.mulf %20, %16 : vector<1x4x1xf32>
    %25 = arith.mulf %7, %24 : vector<1x4x1xf32>
    %26 = arith.subf %23, %25 : vector<1x4x1xf32>
    %27 = vector.broadcast %24 : vector<1x4x1xf32> to vector<2x4x256xf32>
    %28 = arith.mulf %0, %27 : vector<2x4x256xf32>
    %29 = vector.broadcast %26 : vector<1x4x1xf32> to vector<2x4x256xf32>
    %30 = arith.addf %28, %29 : vector<2x4x256xf32>
    %c0_9 = arith.constant 0 : index
    %c0_10 = arith.constant 0 : index
    %c0_11 = arith.constant 0 : index
    %31 = vector.load %arg4[%c0_9, %c0_10, %c0_11] : memref<2x4x256xf32, #tpu.memory_space<vmem>>, vector<2x4x256xf32>
    tpu.vector_store %arg4[%c0_9, %c0_10, %c0_11], %30 {strides = array<i32>} : memref<2x4x256xf32, #tpu.memory_space<vmem>>, vector<2x4x256xf32>,
    return
  }
  func.func @transform_0(%arg0: i32) -> (i32, i32, i32) {
    %c0_i32 = arith.constant 0 : i32
    %c0_i32_0 = arith.constant 0 : i32
    %c0_i32_1 = arith.constant 0 : i32
    return %c0_i32, %arg0, %c0_i32_0 : i32, i32, i32
  }
  func.func @transform_1(%arg0: i32) -> (i32, i32) {
    %c0_i32 = arith.constant 0 : i32
    %c0_i32_0 = arith.constant 0 : i32
    %c0_i32_1 = arith.constant 0 : i32
    return %c0_i32, %c0_i32_0 : i32, i32
  }
  func.func @transform_2(%arg0: i32) -> (i32, i32) {
    %c0_i32 = arith.constant 0 : i32
    %c0_i32_0 = arith.constant 0 : i32
    %c0_i32_1 = arith.constant 0 : i32
    return %c0_i32, %c0_i32_0 : i32, i32
  }
  func.func @transform_3(%arg0: i32) -> (i32, i32, i32) {
    %c0_i32 = arith.constant 0 : i32
    %c0_i32_0 = arith.constant 0 : i32
    %c0_i32_1 = arith.constant 0 : i32
    return %c0_i32, %arg0, %c0_i32_0 : i32, i32, i32
  }
}

</mosaic_0001>

<bundles_post_ra>
// kernel: tpu_custom_call.1
= control target key start
LH: loop header
LB: loop body
LE: loop exit
PB: predicated region body
PF: predicated region fallthrough
CT: control target
= control target key end

     0   :  { %8 = vsyncpa [#allocation3], 0  ;;  %s256_s0 = inlined_call_operand.hbm [shape: f32[2,4,256], index: 0, kind: input, shape index: {}]   ;;  %s257_s1 = inlined_call_operand.vmem [shape: f32[4,1], index: 1, kind: input, shape index: {}]   ;;  %s258_s2 = inlined_call_operand.vmem [shape: f32[4,1], index: 2, kind: input, shape index: {}]   ;;  %s259_s3 = inlined_call_operand.hbm [shape: f32[2,4,256], index: 3, kind: output, shape index: {}]  }
   0x1   :  { %9 = vsyncpa [#allocation4], 0  ;;  %s186_s12 = smov [#allocation2]   ;;  %s138_s16 = scalar_lea.hbm %s256_s0, 256 }
   0x2   :  { %s15_s13 = sshll.u32 %s186_s12, 4  ;;  %p139_p0 = scmp.ne.s32.totalorder %s256_s0, %s138_s16  ;;  %s16_s13 = int_to_ptr.vmem [resolvable:$true] %s15_s13 }
   0x3   :  { %p142_p1 = scmp.lt.u32.totalorder %s138_s16, %s256_s0 }
   0x5   :  { %p144_p2 = pnand %p142_p1, %p139_p0 }
   0x7   :  { %147 = shalt.err (!%p144_p2)
}
   0x8   :  { %s148_s21 = scalar_lea.vmem %s16_s13, 256  ;;  %p153_p4 = scmp.lt.s32.totalorder %s16_s13, %s16_s13 }
   0x9   :  { %p149_p3 = scmp.ne.s32.totalorder %s16_s13, %s148_s21  ;;  %p154_p5 = scmp.lt.s32.totalorder %s148_s21, %s148_s21 }
   0xb   :  { %p155_p6 = por %p154_p5, %p153_p4 }
   0xd   :  { %p156_p7 = pnand %p155_p6, %p149_p3 }
   0xf   :  { %159 = shalt.err (!%p156_p7)
}
  0x10   :  { %s187_s22 = smov 128   ;;  %s188_s23 = smov 8  }
  0x11   :  { %21 = dma.hbm_to_vmem [thread:$0]  %s256_s0, 256, %s16_s13, [#allocation3], %s187_s22, %s187_s22, %s188_s23  }
  0x12   :  { %182 = dma.done.wait [#allocation3], 256  }
  0x13   :  { %183 = vsyncadd [#allocation3], 4294967040  ;;  %vm37_vm0 = vcmask 1043456   ;;  %v29_v0 = vld [vmem:[#allocation2] sm:$0xff]  ;;  %v30_v1 = vld [vmem:[#allocation2 + $0x8] sm:$0xff]  ;;  %v189_v22 = vmov 0   ;;  %v86_v39 = vlaneseq }
  0x14   :  { %v33_v2 = vcombine.high %v29_v0, %v29_v0  ;;  %v34_v3 = vcombine.high %v30_v1, %v30_v1  ;;  %v38_v4 = vsel %vm37_vm0, %v29_v0, 0.0  ;;  %v47_v5 = vmul.f32 %v29_v0, %v29_v0  ;;  %132 = vset.pattern.permute.xlu1 %v189_v22  ;;  %133 = vset.pattern.permute.xlu0 %v189_v22  ;;  %v73_v31 = vld [vmem:[%s257_s1] sm:$0xf]  ;;  %s191_s1 = smov [#allocation5]  }
  0x15   :  { %v48_v6 = vmul.f32 %v30_v1, %v30_v1  ;;  %v41_v8 = vsel %vm37_vm0, %v30_v1, 0.0  ;;  %v75_v34 = vld [vmem:[%s258_s2] sm:$0xf]  ;;  %v190_v37 = vmov 839922192   ;;  %v87_v41 = vshrl.u32 %v86_v39, 7 }
  0x16   :  { %v39_v7 = vsel %vm37_vm0, %v33_v2, 0.0  ;;  %v51_v10 = vcombine.high %v47_v5, %v47_v5  ;;  %v55_v12 = vsel %vm37_vm0, %v47_v5, 0.0  ;;  %v43_v13 = vsel %vm37_vm0, %v34_v3, 0.0  ;;  %s114_s29 = sshll.u32 %s191_s1, 4  ;;  %s115_s29 = int_to_ptr.vmem [resolvable:$true] %s114_s29 }
  0x17   :  { %v40_v9 = vadd.f32 %v39_v7, %v38_v4  ;;  %v52_v11 = vcombine.high %v48_v6, %v48_v6  ;;  %v58_v16 = vsel %vm37_vm0, %v48_v6, 0.0  ;;  %v84_v38 = vunpack.c.l.s4 %v190_v37  ;;  %s160_s2 = scalar_lea.vmem %s115_s29, 256  ;;  %p165_p9 = scmp.lt.s32.totalorder %s115_s29, %s115_s29 }
  0x18   :  { %v56_v15 = vsel %vm37_vm0, %v51_v10, 0.0  ;;  %p161_p8 = scmp.ne.s32.totalorder %s115_s29, %s160_s2  ;;  %p166_p10 = scmp.lt.s32.totalorder %s160_s2, %s160_s2 }
  0x19   :  { %v42_v14 = vadd.f32 %v41_v8, %v40_v9  ;;  %v57_v17 = vadd.f32 %v56_v15, %v55_v12  ;;  %v60_v19 = vsel %vm37_vm0, %v52_v11, 0.0  ;;  %v85_v40 = vunpack.c.0.s8 %v84_v38 }
  0x1a   :  { %p167_p11 = por %p166_p10, %p165_p9 }
  0x1b   :  { %v44_v18 = vadd.f32 %v43_v13, %v42_v14  ;;  %v59_v20 = vadd.f32 %v58_v16, %v57_v17  ;;  %v88_v42 = vsub.s32 %v85_v40, %v87_v41 }
  0x1c   :  { %p168_p12 = pnand %p167_p11, %p161_p8 }
  0x1d   :  { %45 = vadd.xlane.f32.xlu0 %v44_v18  ;;  %v61_v21 = vadd.f32 %v60_v19, %v59_v20 }
  0x21   :  { %62 = vadd.xlane.f32.xlu0 %v61_v21 }
  0xaa   :  { %v46_v23 = vpop.xlane.xlu0 %45 }
  0xab   :  { %v64_v24 = vmul.f32 0.001953125, %v46_v23 }
  0xad   :  { %v66_v26 = vmul.f32 %v64_v24, %v64_v24 }
  0xae   :  { %v63_v25 = vpop.xlane.xlu0 %62 }
  0xaf   :  { %v65_v27 = vmul.f32 0.001953125, %v63_v25 }
  0xb1   :  { %v67_v28 = vsub.f32 %v65_v27, %v66_v26 }
  0xb3   :  { %v68_v29 = vmax.f32 %v67_v28, 0.0 }
  0xb5   :  { %v69_v30 = vadd.f32 1e-05, %v68_v29 }
  0xb7   :  { %136 = vrsqrt.f32 %v69_v30 }
  0xc1   :  { %v137_v32 = vpop.eup %136 }
  0xc2   :  { %v76_v33 = vmul.f32 %v137_v32, %v73_v31 }
  0xc4   :  { %81 = vperm.xlu1 %132, %v76_v33   ;;  %v77_v35 = vmul.f32 %v76_v33, %v64_v24 }
  0xc6   :  { %v78_v36 = vsub.f32 %v75_v34, %v77_v35 }
  0xc8   :  { %95 = vperm.xlu1 %132, %v78_v36  }
 0x143   :  { %v82_v43 = vpop.permute.xlu1 %81 }
 0x144   :  { %v89_v44 = vrot.slane %v82_v43, %v88_v42 }
 0x146   :  { %v91_v46 = vmul.f32 %v89_v44, %v29_v0  ;;  %v92_v47 = vmul.f32 %v89_v44, %v30_v1 }
 0x147   :  { %v96_v45 = vpop.permute.xlu1 %95 }
 0x148   :  { %v103_v48 = vrot.slane %v96_v45, %v88_v42 }
 0x14a   :  { %v105_v49 = vadd.f32 %v103_v48, %v91_v46  ;;  %v106_v50 = vadd.f32 %v103_v48, %v92_v47 }
 0x14c   :  { %107 = vst [vmem:[#allocation5] sm:$0xff] %v105_v49  ;;  %108 = vst [vmem:[#allocation5 + $0x8] sm:$0xff] %v106_v50 }
 0x14d   :  { %171 = shalt.err (!%p168_p12)
}
 0x14e   :  { %s172_s5 = scalar_lea.hbm %s259_s3, 256 }
 0x14f   :  { %p173_p13 = scmp.ne.s32.totalorder %s259_s3, %s172_s5  ;;  %p176_p0 = scmp.lt.u32.totalorder %s172_s5, %s259_s3 }
 0x151   :  { %p178_p1 = pnand %p176_p0, %p173_p13 }
 0x153   :  { %181 = shalt.err (!%p178_p1)
}
 0x154   :  { %120 = dma.vmem_to_hbm [thread:$0]  %s115_s29, 256, %s259_s3, [#allocation4], %s187_s22, %s187_s22, %s188_s23  }
 0x155   :  { %184 = dma.done.wait [#allocation4], 256  }
 0x156   :  { %185 = vsyncadd [#allocation4], 4294967040 }
 0x157   :  { %124 = vsyncpa [#allocation3], 1 }
 0x158   :  { %125 = vsyncpa [#allocation4], 1 }

</bundles_post_ra>
